<compile_context>
chip_gen: v7x
topology: tpu7x:2x2x1
jax: 0.10.0
libtpu: 0.0.40
codegen_flags: <defaults>
</compile_context>

<pallas_src>
import functools

import jax
import jax.numpy as jnp
from jax.experimental import pallas as pl
from jax.experimental.pallas import tpu as pltpu


def _round_up(x, m):
    return ((x + m - 1) // m) * m


def _pick_tb(batch, tb_target):
    """Batch tile: multiple of 8, <= batch, small tail waste, >=2 steps if cheap."""
    if batch < 8:
        # Block equals the full batch dim (allowed by the (8,128) layout rule).
        return batch
    candidates = [c for c in (1024, 512, 256, 128, 64, 32, 16, 8)
                  if c <= min(tb_target, batch)]
    if not candidates:
        candidates = [8]
    best_key, best_tb = None, candidates[-1]
    for tb in candidates:
        steps = -(-batch // tb)
        padded = steps * tb
        waste = padded - batch                 # garbage rows in the last block
        waste_ok = waste * 8 <= padded         # <= 12.5% garbage rows
        if waste_ok:
            # Prefer >=2 grid steps (v7x megacore + DMA/compute overlap), then
            # the largest tile (amortizes ~0.35us/step grid overhead).
            key = (0, 0 if steps >= 2 else 1, -tb, waste)
        else:
            # Awkward batch: minimize total processed rows, prefer bigger tile.
            key = (1, padded, -tb, 0)
        if best_key is None or key < best_key:
            best_key, best_tb = key, tb
    return best_tb


def _resident_spec(shape):
    """Constant-index (VMEM-resident) BlockSpec; single-buffered when supported."""
    index_map = lambda i: (0,) * len(shape)
    try:
        # Weights never change block index across grid steps -> one buffer.
        return pl.BlockSpec(shape, index_map, pipeline_mode=pl.Buffered(1))
    except (AttributeError, TypeError):
        return pl.BlockSpec(shape, index_map)


def _mlp_classifier_kernel(x_ref, w1_ref, b1_ref, w2_ref, b2_ref, out_ref):
    # x_ref:  [TB, Dp] f32     w1_ref: [Dp, Hp] bf16    b1_ref: [1, Hp] f32
    # w2_ref: [Hp, Kp] bf16    b2_ref: [1, Kp]  f32     out_ref:[TB, Kp] f32
    # Cast x to bf16 in VMEM (VPU) right before the MXU dot: x is read from
    # HBM exactly once, as f32, with no wrapper-side bf16 copy.
    x = x_ref[...].astype(jnp.bfloat16)
    h = jnp.dot(x, w1_ref[...], preferred_element_type=jnp.float32)
    h = jnp.maximum(h + b1_ref[...], 0.0)               # bias + ReLU in f32
    logits = jnp.dot(h.astype(w2_ref.dtype), w2_ref[...],
                     preferred_element_type=jnp.float32)
    out_ref[...] = (logits + b2_ref[...]).astype(out_ref.dtype)


@functools.partial(jax.jit, static_argnames=("tb_target",))
def classifier_forward(x_nchw, w1, b1, w2, b2, *, tb_target=512):
    """Classification forward pass as a single batch-tiled Pallas kernel.

    x_nchw : [B, C, H, W] float32 (NCHW, PyTorch convention)
    w1     : [D, HIDDEN]  float32, D = C*H*W
    b1     : [HIDDEN]     float32
    w2     : [HIDDEN, K]  float32
    b2     : [K]          float32
    returns logits [B, K] float32
    """
    B = x_nchw.shape[0]
    D, HIDDEN = w1.shape
    K = w2.shape[1]

    Dp = _round_up(D, 128)       # contraction dim full-width for the MXU
    Hp = _round_up(HIDDEN, 128)  # hidden lanes
    Kp = _round_up(K, 128)       # lane-dense output -> unmasked vst
    TB = _pick_tb(B, tb_target)
    grid = (pl.cdiv(B, TB),)     # partial last block handled by Pallas

    # x: flatten only (free bitcast). Pad the feature dim only when misaligned
    # (padding materializes an HBM copy of x, so skip it when already aligned).
    x2d = x_nchw.reshape(B, D).astype(jnp.float32)
    if Dp != D:
        x2d = jnp.pad(x2d, ((0, 0), (0, Dp - D)))

    # Weights/biases: zero-pad to lane-aligned shapes (one-time, tiny vs x).
    # Pad columns/rows are exact zeros -> they contribute nothing through ReLU
    # and the second matmul; the extra class columns are sliced off below.
    w1_p = jnp.zeros((Dp, Hp), jnp.float32).at[:D, :HIDDEN].set(w1).astype(jnp.bfloat16)
    b1_p = jnp.zeros((1, Hp), jnp.float32).at[0, :HIDDEN].set(b1)
    w2_p = jnp.zeros((Hp, Kp), jnp.float32).at[:HIDDEN, :K].set(w2).astype(jnp.bfloat16)
    b2_p = jnp.zeros((1, Kp), jnp.float32).at[0, :K].set(b2)

    # Honest (unpadded) scheduler hint.
    cost = pl.CostEstimate(
        flops=2 * B * (D * HIDDEN + HIDDEN * K),
        transcendentals=0,
        bytes_accessed=(B * D * 4 + D * HIDDEN * 2 + HIDDEN * K * 2
                        + (HIDDEN + K) * 4 + B * K * 4),
    )

    # VMEM footprint: x/out double-buffered, weights single-buffered, plus
    # in-kernel temporaries; 2x headroom, never below the usual 32 MiB scoped
    # default, capped at v7x's 64 MiB physical VMEM.
    vmem_est = (2 * TB * Dp * 4 + 2 * TB * Kp * 4          # x, out tiles
                + Dp * Hp * 2 + Hp * Kp * 2                # bf16 weights
                + (Hp + Kp) * 4                            # biases
                + TB * (Dp * 2 + Hp * 4 + 2 * Kp * 4))     # kernel temporaries
    vmem_limit = int(min(64 * 2 ** 20, max(32 * 2 ** 20, 2 * vmem_est)))

    logits_p = pl.pallas_call(
        _mlp_classifier_kernel,
        out_shape=jax.ShapeDtypeStruct((B, Kp), jnp.float32),
        grid=grid,
        in_specs=[
            pl.BlockSpec((TB, Dp), lambda i: (i, 0)),   # x: batch-tiled, pipelined
            _resident_spec((Dp, Hp)),                   # w1: VMEM-resident, 1 buffer
            _resident_spec((1, Hp)),                    # b1
            _resident_spec((Hp, Kp)),                   # w2
            _resident_spec((1, Kp)),                    # b2
        ],
        out_specs=pl.BlockSpec((TB, Kp), lambda i: (i, 0)),
        compiler_params=pltpu.CompilerParams(
            dimension_semantics=("parallel",),
            vmem_limit_bytes=vmem_limit,
        ),
        cost_estimate=cost,
    )(x2d, w1_p, b1_p, w2_p, b2_p)

    return logits_p[:, :K]


def _reference_forward(x_nchw, w1, b1, w2, b2):
    """Pure-JAX f32 reference for correctness checking."""
    B = x_nchw.shape[0]
    x2d = x_nchw.reshape(B, -1).astype(jnp.float32)
    h = jnp.maximum(x2d @ w1 + b1[None, :], 0.0)
    return h @ w2 + b2[None, :]


if __name__ == "__main__":
    # Small deterministic shapes consistent with an NCHW classification input.
    B, C, IMG_H, IMG_W = 2, 4, 16, 16
    D = C * IMG_H * IMG_W          # 1024 flattened features
    HIDDEN = 32
    NUM_CLASSES = 10

    key = jax.random.PRNGKey(0)
    k_x, k_w1, k_b1, k_w2, k_b2 = jax.random.split(key, 5)

    x = jax.random.normal(k_x, (B, C, IMG_H, IMG_W), dtype=jnp.float32)
    # Deterministic parameter init (synthetic, not a checkpoint load).
    w1 = jax.random.normal(k_w1, (D, HIDDEN), dtype=jnp.float32) * (1.0 / jnp.sqrt(D))
    b1 = jax.random.normal(k_b1, (HIDDEN,), dtype=jnp.float32) * 0.01
    w2 = jax.random.normal(k_w2, (HIDDEN, NUM_CLASSES), dtype=jnp.float32) * (1.0 / jnp.sqrt(HIDDEN))
    b2 = jax.random.normal(k_b2, (NUM_CLASSES,), dtype=jnp.float32) * 0.01

    logits = jax.block_until_ready(classifier_forward(x, w1, b1, w2, b2))

    ref = _reference_forward(x, w1, b1, w2, b2)
    assert logits.shape == (B, NUM_CLASSES)
    # bf16 operands with f32 accumulation -> loose-ish tolerance vs f32 ref.
    assert jnp.allclose(logits, ref, atol=5e-2, rtol=5e-2), "mismatch vs reference"

    print("KERNEL_OK")
</pallas_src>

<mosaic_0001>
module attributes {stable_mosaic.version = 11 : i64} {
  func.func @_mlp_classifier_kernel(%arg0: i32, %arg1: memref<2x1024xf32, #tpu.memory_space<vmem>>, %arg2: memref<1024x128xbf16, #tpu.memory_space<vmem>>, %arg3: memref<1x128xf32, #tpu.memory_space<vmem>>, %arg4: memref<128x128xbf16, #tpu.memory_space<vmem>>, %arg5: memref<1x128xf32, #tpu.memory_space<vmem>>, %arg6: memref<2x128xf32, #tpu.memory_space<vmem>>) attributes {dimension_semantics = [#tpu.dimension_semantics<parallel>], iteration_bounds = array<i64: 1>, scalar_prefetch = 0 : i64, scratch_operands = 0 : i64, tpu.core_type = #tpu.core_type<tc>, window_params = [{transform_indices = @transform_0, window_bounds = array<i64: 2, 1024>}, {pipeline_mode = #tpu.pipeline_mode<synchronous>, transform_indices = @transform_1, window_bounds = array<i64: 1024, 128>}, {pipeline_mode = #tpu.pipeline_mode<synchronous>, transform_indices = @transform_2, window_bounds = array<i64: 1, 128>}, {pipeline_mode = #tpu.pipeline_mode<synchronous>, transform_indices = @transform_3, window_bounds = array<i64: 128, 128>}, {pipeline_mode = #tpu.pipeline_mode<synchronous>, transform_indices = @transform_4, window_bounds = array<i64: 1, 128>}, {transform_indices = @transform_5, window_bounds = array<i64: 2, 128>}]} {
    %c0 = arith.constant 0 : index
    %c0_0 = arith.constant 0 : index
    %0 = vector.load %arg1[%c0, %c0_0] : memref<2x1024xf32, #tpu.memory_space<vmem>>, vector<2x1024xf32>
    %1 = arith.truncf %0 : vector<2x1024xf32> to vector<2x1024xbf16>
    %c0_1 = arith.constant 0 : index
    %c0_2 = arith.constant 0 : index
    %2 = vector.load %arg2[%c0_1, %c0_2] : memref<1024x128xbf16, #tpu.memory_space<vmem>>, vector<1024x128xbf16>
    %cst = arith.constant dense<0.000000e+00> : vector<2x128xf32>
    %3 = tpu.matmul %1, %2, %cst {dimension_numbers = #tpu.dot_dimension_numbers<[1], [0], [0], [1], [0, 0, 1, 1], [], []>} : vector<2x1024xbf16>, vector<1024x128xbf16>, vector<2x128xf32> -> vector<2x128xf32>
    %c0_3 = arith.constant 0 : index
    %c0_4 = arith.constant 0 : index
    %4 = vector.load %arg3[%c0_3, %c0_4] : memref<1x128xf32, #tpu.memory_space<vmem>>, vector<1x128xf32>
    %5 = vector.broadcast %4 : vector<1x128xf32> to vector<2x128xf32>
    %6 = arith.addf %3, %5 : vector<2x128xf32>
    %cst_5 = arith.constant 0.000000e+00 : f32
    %7 = vector.broadcast %cst_5 : f32 to vector<2x128xf32>
    %8 = arith.maximumf %6, %7 : vector<2x128xf32>
    %9 = arith.truncf %8 : vector<2x128xf32> to vector<2x128xbf16>
    %c0_6 = arith.constant 0 : index
    %c0_7 = arith.constant 0 : index
    %10 = vector.load %arg4[%c0_6, %c0_7] : memref<128x128xbf16, #tpu.memory_space<vmem>>, vector<128x128xbf16>
    %cst_8 = arith.constant dense<0.000000e+00> : vector<2x128xf32>
    %11 = tpu.matmul %9, %10, %cst_8 {dimension_numbers = #tpu.dot_dimension_numbers<[1], [0], [0], [1], [0, 0, 1, 1], [], []>} : vector<2x128xbf16>, vector<128x128xbf16>, vector<2x128xf32> -> vector<2x128xf32>
    %c0_9 = arith.constant 0 : index
    %c0_10 = arith.constant 0 : index
    %12 = vector.load %arg5[%c0_9, %c0_10] : memref<1x128xf32, #tpu.memory_space<vmem>>, vector<1x128xf32>
    %13 = vector.broadcast %12 : vector<1x128xf32> to vector<2x128xf32>
    %14 = arith.addf %11, %13 : vector<2x128xf32>
    %c0_11 = arith.constant 0 : index
    %c0_12 = arith.constant 0 : index
    %15 = vector.load %arg6[%c0_11, %c0_12] : memref<2x128xf32, #tpu.memory_space<vmem>>, vector<2x128xf32>
    tpu.vector_store %arg6[%c0_11, %c0_12], %14 {strides = array<i32>} : memref<2x128xf32, #tpu.memory_space<vmem>>, vector<2x128xf32>,
    return
  }
  func.func @transform_0(%arg0: i32) -> (i32, i32) {
    %c0_i32 = arith.constant 0 : i32
    %c0_i32_0 = arith.constant 0 : i32
    return %arg0, %c0_i32 : i32, i32
  }
  func.func @transform_1(%arg0: i32) -> (i32, i32) {
    %c0_i32 = arith.constant 0 : i32
    %c0_i32_0 = arith.constant 0 : i32
    %c0_i32_1 = arith.constant 0 : i32
    return %c0_i32, %c0_i32_0 : i32, i32
  }
  func.func @transform_2(%arg0: i32) -> (i32, i32) {
    %c0_i32 = arith.constant 0 : i32
    %c0_i32_0 = arith.constant 0 : i32
    %c0_i32_1 = arith.constant 0 : i32
    return %c0_i32, %c0_i32_0 : i32, i32
  }
  func.func @transform_3(%arg0: i32) -> (i32, i32) {
    %c0_i32 = arith.constant 0 : i32
    %c0_i32_0 = arith.constant 0 : i32
    %c0_i32_1 = arith.constant 0 : i32
    return %c0_i32, %c0_i32_0 : i32, i32
  }
  func.func @transform_4(%arg0: i32) -> (i32, i32) {
    %c0_i32 = arith.constant 0 : i32
    %c0_i32_0 = arith.constant 0 : i32
    %c0_i32_1 = arith.constant 0 : i32
    return %c0_i32, %c0_i32_0 : i32, i32
  }
  func.func @transform_5(%arg0: i32) -> (i32, i32) {
    %c0_i32 = arith.constant 0 : i32
    %c0_i32_0 = arith.constant 0 : i32
    return %arg0, %c0_i32 : i32, i32
  }
}

</mosaic_0001>

<bundles_post_ra>
// kernel: classifier_forward.1
= control target key start
LH: loop header
LB: loop body
LE: loop exit
PB: predicated region body
PF: predicated region fallthrough
CT: control target
= control target key end

     0   :  { %v30_v28 = vlaneseq  ;;  %v1176_v36 = vmov 1983009808   ;;  %s1456_s0 = inlined_call_operand.vmem [shape: f32[2,1024], index: 0, kind: input, shape index: {}]   ;;  %s1457_s1 = inlined_call_operand.vmem [shape: bf16[1024,128], index: 1, kind: input, shape index: {}]   ;;  %s1458_s2 = inlined_call_operand.vmem [shape: f32[1,128], index: 2, kind: input, shape index: {}]   ;;  %s1459_s3 = inlined_call_operand.vmem [shape: bf16[128,128], index: 3, kind: input, shape index: {}]   ;;  %s1460_s4 = inlined_call_operand.vmem [shape: f32[1,128], index: 4, kind: input, shape index: {}]   ;;  %s1461_s5 = inlined_call_operand.hbm [shape: f32[2,128], index: 5, kind: output, shape index: {}]  }
   0x1   :  { %v1078_v0 = vld [vmem:[%s1457_s1 + $0x40] sm:$0xff]   ;;  %v1082_v4 = vld [vmem:[%s1457_s1 + $0x48] sm:$0xff]   ;;  %v1086_v8 = vld [vmem:[%s1457_s1 + $0x50] sm:$0xff]   ;;  %v28_v37 = vunpack.c.l.s4 %v1176_v36 }
   0x2   :  { %v1079_v1 = vld [vmem:[%s1457_s1 + $0xc0] sm:$0xff]   ;;  %957 = vmatprep.subr.bf16.mxu0 %v1078_v0  ;;  %v1083_v5 = vld [vmem:[%s1457_s1 + $0xc8] sm:$0xff]   ;;  %v1087_v9 = vld [vmem:[%s1457_s1 + $0xd0] sm:$0xff]   ;;  %v31_v33 = vshrl.u32 %v30_v28, 7 }
   0x3   :  { %v1080_v2 = vld [vmem:[%s1457_s1] sm:$0xff]   ;;  %979 = vmatprep.subr.bf16.mxu1 %v1079_v1  ;;  %v1084_v6 = vld [vmem:[%s1457_s1 + $0x8] sm:$0xff]   ;;  %v1088_v10 = vld [vmem:[%s1457_s1 + $0x10] sm:$0xff]   ;;  %v29_v39 = vunpack.c.0.s8 %v28_v37 }
   0x4   :  { %v1081_v3 = vld [vmem:[%s1457_s1 + $0x80] sm:$0xff]   ;;  %958 = vmatpush3.bf16.msra.mxu0 %v1080_v2  ;;  %v1085_v7 = vld [vmem:[%s1457_s1 + $0x88] sm:$0xff]   ;;  %v1089_v11 = vld [vmem:[%s1457_s1 + $0x90] sm:$0xff]  }
   0x5   :  { %980 = vmatpush3.bf16.msra.mxu1 %v1081_v3  ;;  %959 = vmatprep.subr.bf16.mxu0 %v1082_v4  ;;  %v1090_v12 = vld [vmem:[%s1457_s1 + $0x58] sm:$0xff]   ;;  %v1094_v16 = vld [vmem:[%s1457_s1 + $0x60] sm:$0xff]   ;;  %v1098_v20 = vld [vmem:[%s1457_s1 + $0x68] sm:$0xff]   ;;  %v1315_v41 = vsub.s32 %v29_v39, %v31_v33 }
   0x6   :  { %981 = vmatprep.subr.bf16.mxu1 %v1083_v5  ;;  %v1091_v13 = vld [vmem:[%s1457_s1 + $0xd8] sm:$0xff]   ;;  %v1095_v17 = vld [vmem:[%s1457_s1 + $0xe0] sm:$0xff]   ;;  %v1099_v21 = vld [vmem:[%s1457_s1 + $0xe8] sm:$0xff]  }
   0x7   :  { %v1092_v14 = vld [vmem:[%s1457_s1 + $0x18] sm:$0xff]   ;;  %v1096_v18 = vld [vmem:[%s1457_s1 + $0x20] sm:$0xff]   ;;  %v1100_v22 = vld [vmem:[%s1457_s1 + $0x28] sm:$0xff]  }
   0x8   :  { %960 = vmatpush3.bf16.msra.mxu0 %v1084_v6  ;;  %v1093_v15 = vld [vmem:[%s1457_s1 + $0x98] sm:$0xff]   ;;  %v1097_v19 = vld [vmem:[%s1457_s1 + $0xa0] sm:$0xff]   ;;  %v1101_v23 = vld [vmem:[%s1457_s1 + $0xa8] sm:$0xff]  }
   0x9   :  { %982 = vmatpush3.bf16.msra.mxu1 %v1085_v7  ;;  %961 = vmatprep.subr.bf16.mxu0 %v1086_v8  ;;  %v1102_v24 = vld [vmem:[%s1457_s1 + $0x70] sm:$0xff]   ;;  %v1106_v29 = vld [vmem:[%s1457_s1 + $0x78] sm:$0xff]   ;;  %v22_v34 = vld [vmem:[%s1456_s0] sm:$0xff] }
   0xa   :  { %983 = vmatprep.subr.bf16.mxu1 %v1087_v9  ;;  %v1103_v25 = vld [vmem:[%s1457_s1 + $0xf0] sm:$0xff]   ;;  %v1107_v30 = vld [vmem:[%s1457_s1 + $0xf8] sm:$0xff]   ;;  %v1111_v35 = vld [vmem:[%s1457_s1 + $0x140] sm:$0xff]   ;;  %v26_v40 = vcombine.high %v22_v34, %v22_v34  ;;  %v33_v42 = vrot.slane %v22_v34, %v1315_v41 }
   0xb   :  { %v1104_v26 = vld [vmem:[%s1457_s1 + $0x30] sm:$0xff]   ;;  %v1108_v31 = vld [vmem:[%s1457_s1 + $0x38] sm:$0xff]   ;;  %v1112_v38 = vld [vmem:[%s1457_s1 + $0x1c0] sm:$0xff]  }
   0xc   :  { %962 = vmatpush3.bf16.msra.mxu0 %v1088_v10  ;;  %v1105_v27 = vld [vmem:[%s1457_s1 + $0xb0] sm:$0xff]   ;;  %v1109_v32 = vld [vmem:[%s1457_s1 + $0xb8] sm:$0xff]   ;;  %v40_v43 = vrot.slane %v26_v40, %v1315_v41  ;;  %v41_v44 = vcombine.high %v33_v42, %v33_v42  ;;  %v1113_v46 = vld [vmem:[%s1457_s1 + $0x100] sm:$0xff]   ;;  %v68_v47 = vpack.c.bf16 %v33_v42, %v33_v42 }
   0xd   :  { %984 = vmatpush3.bf16.msra.mxu1 %v1089_v11  ;;  %963 = vmatprep.subr.bf16.mxu0 %v1090_v12  ;;  %v1114_v49 = vld [vmem:[%s1457_s1 + $0x180] sm:$0xff]   ;;  %v1115_v52 = vld [vmem:[%s1457_s1 + $0x148] sm:$0xff]   ;;  %v1119_v56 = vld [vmem:[%s1457_s1 + $0x150] sm:$0xff]  }
   0xe   :  { %985 = vmatprep.subr.bf16.mxu1 %v1091_v13  ;;  %v42_v45 = vcombine.high %v40_v43, %v40_v43  ;;  %v70_v48 = vpack.c.bf16 %v40_v43, %v40_v43  ;;  %v69_v50 = vpack.c.bf16 %v41_v44, %v41_v44  ;;  %v1116_v53 = vld [vmem:[%s1457_s1 + $0x1c8] sm:$0xff]   ;;  %v1120_v57 = vld [vmem:[%s1457_s1 + $0x1d0] sm:$0xff]   ;;  %v1123_v60 = vld [vmem:[%s1457_s1 + $0x158] sm:$0xff]  }
   0xf   :  { %v1117_v54 = vld [vmem:[%s1457_s1 + $0x108] sm:$0xff]   ;;  %v1121_v58 = vld [vmem:[%s1457_s1 + $0x110] sm:$0xff]   ;;  %v1124_v61 = vld [vmem:[%s1457_s1 + $0x1d8] sm:$0xff]  }
  0x10   :  { %964 = vmatpush3.bf16.msra.mxu0 %v1092_v14  ;;  %v71_v51 = vpack.c.bf16 %v42_v45, %v42_v45  ;;  %627 = vmatprep.mubr.bf16.mxu0 %v69_v50  ;;  %v1118_v55 = vld [vmem:[%s1457_s1 + $0x188] sm:$0xff]   ;;  %v1122_v59 = vld [vmem:[%s1457_s1 + $0x190] sm:$0xff]   ;;  %v1125_v62 = vld [vmem:[%s1457_s1 + $0x118] sm:$0xff]  }
  0x11   :  { %986 = vmatpush3.bf16.msra.mxu1 %v1093_v15  ;;  %965 = vmatprep.subr.bf16.mxu0 %v1094_v16  ;;  %v1126_v63 = vld [vmem:[%s1457_s1 + $0x198] sm:$0xff]   ;;  %v1127_v0 = vld [vmem:[%s1457_s1 + $0x160] sm:$0xff]   ;;  %v1131_v4 = vld [vmem:[%s1457_s1 + $0x168] sm:$0xff]  }
  0x12   :  { %987 = vmatprep.subr.bf16.mxu1 %v1095_v17  ;;  %667 = vmatprep.mubr.bf16.mxu1 %v71_v51  ;;  %v1128_v1 = vld [vmem:[%s1457_s1 + $0x1e0] sm:$0xff]   ;;  %v1132_v5 = vld [vmem:[%s1457_s1 + $0x1e8] sm:$0xff]   ;;  %v1135_v8 = vld [vmem:[%s1457_s1 + $0x170] sm:$0xff]  }
  0x13   :  { %v1129_v2 = vld [vmem:[%s1457_s1 + $0x120] sm:$0xff]   ;;  %v1133_v6 = vld [vmem:[%s1457_s1 + $0x128] sm:$0xff]   ;;  %v1136_v9 = vld [vmem:[%s1457_s1 + $0x1f0] sm:$0xff]  }
  0x14   :  { %966 = vmatpush3.bf16.msra.mxu0 %v1096_v18  ;;  %v1130_v3 = vld [vmem:[%s1457_s1 + $0x1a0] sm:$0xff]   ;;  %v1134_v7 = vld [vmem:[%s1457_s1 + $0x1a8] sm:$0xff]   ;;  %v1137_v11 = vld [vmem:[%s1457_s1 + $0x130] sm:$0xff]  }
  0x15   :  { %988 = vmatpush3.bf16.msra.mxu1 %v1097_v19  ;;  %967 = vmatprep.subr.bf16.mxu0 %v1098_v20  ;;  %v23_v10 = vld [vmem:[%s1456_s0 + $0x8] sm:$0xff]  ;;  %v1138_v12 = vld [vmem:[%s1457_s1 + $0x1b0] sm:$0xff]   ;;  %v1139_v15 = vld [vmem:[%s1457_s1 + $0x178] sm:$0xff]  }
  0x16   :  { %989 = vmatprep.subr.bf16.mxu1 %v1099_v21  ;;  %v50_v13 = vrot.slane %v23_v10, %v1315_v41  ;;  %v43_v14 = vcombine.high %v23_v10, %v23_v10  ;;  %v1140_v16 = vld [vmem:[%s1457_s1 + $0x1f8] sm:$0xff]  }
  0x18   :  { %968 = vmatpush3.bf16.msra.mxu0 %v1100_v22  ;;  %v58_v17 = vcombine.high %v50_v13, %v50_v13  ;;  %v57_v18 = vrot.slane %v43_v14, %v1315_v41 }
  0x19   :  { %990 = vmatpush3.bf16.msra.mxu1 %v1101_v23  ;;  %969 = vmatprep.subr.bf16.mxu0 %v1102_v24 }
  0x1a   :  { %991 = vmatprep.subr.bf16.mxu1 %v1103_v25  ;;  %v73_v19 = vpack.c.bf16 %v58_v17, %v58_v17  ;;  %v59_v20 = vcombine.high %v57_v18, %v57_v18 }
  0x1c   :  { %970 = vmatpush3.bf16.msra.mxu0 %v1104_v26 }
  0x1d   :  { %992 = vmatpush3.bf16.msra.mxu1 %v1105_v27  ;;  %971 = vmatprep.subr.bf16.mxu0 %v1106_v29 }
  0x1e   :  { %993 = vmatprep.subr.bf16.mxu1 %v1107_v30 }
  0x20   :  { %972 = vmatpush3.bf16.msra.mxu0 %v1108_v31 }
  0x21   :  { %994 = vmatpush3.bf16.msra.mxu1 %v1109_v32  ;;  %1001 = vmatprep.subr.bf16.mxu0 %v1111_v35 }
  0x22   :  { %1023 = vmatprep.subr.bf16.mxu1 %v1112_v38 }
  0x23   :  { %628 = vmatmul.mubr.bf16.vlgmr.msra.gmra.mrb[0].mxu0 %v68_v47 }
  0x24   :  { %668 = vmatmul.mubr.bf16.vlgmr.msra.gmra.mrb[0].mxu1 %v70_v48  ;;  %1002 = vmatpush3.bf16.msra.mxu0 %v1113_v46 }
  0x25   :  { %1024 = vmatpush3.bf16.msra.mxu1 %v1114_v49  ;;  %1003 = vmatprep.subr.bf16.mxu0 %v1115_v52 }
  0x26   :  { %1025 = vmatprep.subr.bf16.mxu1 %v1116_v53 }
  0x28   :  { %1004 = vmatpush3.bf16.msra.mxu0 %v1117_v54 }
  0x29   :  { %1026 = vmatpush3.bf16.msra.mxu1 %v1118_v55  ;;  %1005 = vmatprep.subr.bf16.mxu0 %v1119_v56 }
  0x2a   :  { %1027 = vmatprep.subr.bf16.mxu1 %v1120_v57 }
  0x2c   :  { %1006 = vmatpush3.bf16.msra.mxu0 %v1121_v58 }
  0x2d   :  { %1028 = vmatpush3.bf16.msra.mxu1 %v1122_v59  ;;  %1007 = vmatprep.subr.bf16.mxu0 %v1123_v60 }
  0x2e   :  { %1029 = vmatprep.subr.bf16.mxu1 %v1124_v61 }
  0x30   :  { %1008 = vmatpush3.bf16.msra.mxu0 %v1125_v62 }
  0x31   :  { %1030 = vmatpush3.bf16.msra.mxu1 %v1126_v63  ;;  %1009 = vmatprep.subr.bf16.mxu0 %v1127_v0 }
  0x32   :  { %1031 = vmatprep.subr.bf16.mxu1 %v1128_v1 }
  0x34   :  { %1010 = vmatpush3.bf16.msra.mxu0 %v1129_v2 }
  0x35   :  { %1032 = vmatpush3.bf16.msra.mxu1 %v1130_v3  ;;  %1011 = vmatprep.subr.bf16.mxu0 %v1131_v4 }
  0x36   :  { %1033 = vmatprep.subr.bf16.mxu1 %v1132_v5 }
  0x38   :  { %1012 = vmatpush3.bf16.msra.mxu0 %v1133_v6 }
  0x39   :  { %1034 = vmatpush3.bf16.msra.mxu1 %v1134_v7  ;;  %1013 = vmatprep.subr.bf16.mxu0 %v1135_v8 }
  0x3a   :  { %1035 = vmatprep.subr.bf16.mxu1 %v1136_v9 }
  0x3b   :  { %10 = vsyncpa [#allocation3], 0  ;;  %v1141_v21 = vld [vmem:[%s1457_s1 + $0x138] sm:$0xff]   ;;  %v75_v23 = vpack.c.bf16 %v59_v20, %v59_v20  ;;  %707 = vmatprep.mubr.bf16.mxu0 %v73_v19  ;;  %v72_v24 = vpack.c.bf16 %v50_v13, %v50_v13  ;;  %v74_v25 = vpack.c.bf16 %v57_v18, %v57_v18  ;;  %v1144_v26 = vld [vmem:[%s1459_s3] sm:$0xff]   ;;  %v1177_v27 = vmov 0.0   ;;  %s1179_s16 = smov [#allocation2]  }
  0x3c   :  { %1014 = vmatpush3.bf16.msra.mxu0 %v1137_v11  ;;  %v1142_v22 = vld [vmem:[%s1457_s1 + $0x1b8] sm:$0xff]   ;;  %v1145_v28 = vld [vmem:[%s1459_s3 + $0x8] sm:$0xff]   ;;  %v1146_v29 = vld [vmem:[%s1459_s3 + $0x10] sm:$0xff]   ;;  %vm1178_vm0 = vmmov 0   ;;  %s875_s17 = sshll.u32 %s1179_s16, 4  ;;  %s876_s17 = int_to_ptr.vmem [resolvable:$true] %s875_s17 }
  0x3d   :  { %1036 = vmatpush3.bf16.msra.mxu1 %v1138_v12  ;;  %1015 = vmatprep.subr.bf16.mxu0 %v1139_v15  ;;  %v1147_v30 = vld [vmem:[%s1459_s3 + $0x18] sm:$0xff]   ;;  %v1148_v31 = vld [vmem:[%s1459_s3 + $0x20] sm:$0xff]   ;;  %v1149_v32 = vld [vmem:[%s1459_s3 + $0x28] sm:$0xff]   ;;  %s1152_s18 = scalar_lea.vmem %s876_s17, 32  ;;  %p1157_p1 = scmp.lt.s32.totalorder %s876_s17, %s876_s17 }
  0x3e   :  { %1037 = vmatprep.subr.bf16.mxu1 %v1140_v16  ;;  %747 = vmatprep.mubr.bf16.mxu1 %v75_v23  ;;  %v1150_v33 = vld [vmem:[%s1459_s3 + $0x30] sm:$0xff]   ;;  %v1151_v34 = vld [vmem:[%s1459_s3 + $0x38] sm:$0xff]   ;;  %v883_v37 = vld [vmem:[%s1458_s2] ss:$0 sm:$0xff]  ;;  %p1153_p0 = scmp.ne.s32.totalorder %s876_s17, %s1152_s18  ;;  %p1158_p2 = scmp.lt.s32.totalorder %s1152_s18, %s1152_s18 }
  0x3f   :  { %v948_v62 = vld [vmem:[%s1460_s4] ss:$0 sm:$0xff] }
  0x40   :  { %1016 = vmatpush3.bf16.msra.mxu0 %v1141_v21  ;;  %p1159_p3 = por %p1158_p2, %p1157_p1 }
  0x41   :  { %1038 = vmatpush3.bf16.msra.mxu1 %v1142_v22  ;;  %1054 = vmatprep.subr.bf16.mxu0 %v1177_v27 }
  0x42   :  { %p1160_p4 = pnand %p1159_p3, %p1153_p0 }
  0x43   :  { %708 = vmatmul.mubr.bf16.vlgmr.msra.gmra.mrb[4].mxu0 %v72_v24 }
  0x44   :  { %748 = vmatmul.mubr.bf16.vlgmr.msra.gmra.mrb[4].mxu1 %v74_v25  ;;  %1055 = vmatpush3.bf16.msra.mxu0 %v1144_v26 }
  0x45   :  { %1056 = vmatprep.subr.bf16.mxu0 %v1177_v27  ;;  %1070 = vmatprep.mubr.msk.bf16.mxu0 %vm1178_vm0, %v1177_v27 }
  0x48   :  { %1057 = vmatpush3.bf16.msra.mxu0 %v1145_v28 }
  0x49   :  { %1058 = vmatprep.subr.bf16.mxu0 %v1177_v27 }
  0x4c   :  { %1059 = vmatpush3.bf16.msra.mxu0 %v1146_v29 }
  0x4d   :  { %1060 = vmatprep.subr.bf16.mxu0 %v1177_v27 }
  0x50   :  { %1061 = vmatpush3.bf16.msra.mxu0 %v1147_v30 }
  0x51   :  { %1062 = vmatprep.subr.bf16.mxu0 %v1177_v27 }
  0x54   :  { %1063 = vmatpush3.bf16.msra.mxu0 %v1148_v31 }
  0x55   :  { %1064 = vmatprep.subr.bf16.mxu0 %v1177_v27 }
  0x58   :  { %1065 = vmatpush3.bf16.msra.mxu0 %v1149_v32 }
  0x59   :  { %1066 = vmatprep.subr.bf16.mxu0 %v1177_v27 }
  0x5c   :  { %1067 = vmatpush3.bf16.msra.mxu0 %v1150_v33 }
  0x5d   :  { %1068 = vmatprep.subr.bf16.mxu0 %v1177_v27 }
  0x60   :  { %1069 = vmatpush3.bf16.msra.mxu0 %v1151_v34 }
  0xf6   :  { %v973_v35 = vpop.f32.mrb[0].mxu0 }
  0xf7   :  { %v995_v36 = vpop.f32.mrb[0].mxu1  ;;  %v974_v38 = vpop.f32.mrb[1].mxu0 }
  0xf8   :  { %v996_v39 = vpop.f32.mrb[1].mxu1  ;;  %v975_v40 = vadd.f32 %v974_v38, %v973_v35  ;;  %v976_v42 = vpop.f32.mrb[2].mxu0 }
  0xf9   :  { %v997_v41 = vadd.f32 %v996_v39, %v995_v36  ;;  %v998_v43 = vpop.f32.mrb[2].mxu1  ;;  %v977_v44 = vpop.f32.mrb[3].mxu0 }
  0xfa   :  { %v999_v45 = vpop.f32.mrb[3].mxu1  ;;  %v630_v46 = vadd.f32 %v975_v40, %v883_v37 }
  0xfc   :  { %v670_v47 = vadd.f32 %v997_v41, %v630_v46 }
 0x116   :  { %v1017_v48 = vpop.f32.mrb[4].mxu0 }
 0x117   :  { %v1039_v49 = vpop.f32.mrb[4].mxu1  ;;  %v1018_v50 = vpop.f32.mrb[5].mxu0 }
 0x118   :  { %v1040_v51 = vpop.f32.mrb[5].mxu1  ;;  %v1019_v52 = vadd.f32 %v1018_v50, %v1017_v48  ;;  %v1020_v54 = vpop.f32.mrb[6].mxu0 }
 0x119   :  { %v1041_v53 = vadd.f32 %v1040_v51, %v1039_v49  ;;  %v1042_v55 = vpop.f32.mrb[6].mxu1  ;;  %v1021_v56 = vpop.f32.mrb[7].mxu0 }
 0x11a   :  { %v1043_v57 = vpop.f32.mrb[7].mxu1  ;;  %v710_v58 = vadd.f32 %v1019_v52, %v670_v47 }
 0x11c   :  { %v750_v59 = vadd.f32 %v1041_v53, %v710_v58 }
 0x11e   :  { %v755_v60 = vmax.f32 %v750_v59, 0.0 }
 0x120   :  { %v756_v61 = vpack.c.bf16 %v755_v60, %v755_v60 }
 0x122   :  { %1071 = vmatmul.mubr.bf16.vlgmr.msra.gmra.mrb[8].mxu0 %v756_v61 }
 0x1f5   :  { %v862_v63 = vpop.f32.mrb[8].mxu0 }
 0x1f6   :  { %v863_v0 = vadd.f32 %v948_v62, %v862_v63  ;;  %v1072_v1 = vpop.f32.mrb[9].mxu0 }
 0x1f7   :  { %v865_v2 = vpop.f32.mrb[10].mxu0 }
 0x1f8   :  { %868 = vst [vmem:[#allocation2] sm:$0x3] %v863_v0  ;;  %v1073_v3 = vpop.f32.mrb[11].mxu0 }
 0x1f9   :  { %1163 = shalt.err (!%p1160_p4)
}
 0x1fa   :  { %s1164_s4 = scalar_lea.hbm %s1461_s5, 32 }
 0x1fb   :  { %p1165_p5 = scmp.ne.s32.totalorder %s1461_s5, %s1164_s4  ;;  %p1168_p6 = scmp.lt.u32.totalorder %s1164_s4, %s1461_s5 }
 0x1fd   :  { %p1170_p7 = pnand %p1168_p6, %p1165_p5 }
 0x1ff   :  { %1173 = shalt.err (!%p1170_p7)
}
 0x200   :  { %878 = dma.vmem_to_hbm [thread:$0]  %s876_s17, 32, %s1461_s5, [#allocation3]  }
 0x201   :  { %1174 = dma.done.wait [#allocation3], 32  }
 0x202   :  { %1175 = vsyncadd [#allocation3], 4294967264 }
 0x203   :  { %882 = vsyncpa [#allocation3], 1 }

</bundles_post_ra>
